<compile_context>
chip_gen: v6e
topology: v6e:2x2x1
jax: 0.10.0
libtpu: 0.0.40
codegen_flags: <defaults>
</compile_context>

<pallas_src>
import functools

import jax
import jax.numpy as jnp
from jax.experimental import pallas as pl
from jax.experimental.pallas import tpu as pltpu

LANE = 128                     # TPU lane width; all last-dims padded to this.
SUB = 8                        # sublane granularity for f32 row tiles.
VMEM_LIMIT_BYTES = 48 << 20    # explicit scoped-VMEM limit (fits v7x's 64 MiB).
VMEM_TILE_BUDGET = 40 << 20    # target working-set for tile selection.


def _round_up(x, m):
    return (x + m - 1) // m * m


def _pad2d(a, shape):
    return jnp.pad(a, [(0, t - s) for s, t in zip(a.shape, shape)])


# ---------------------------------------------------------------------------
# Pallas kernels
# ---------------------------------------------------------------------------

def _mlp_kernel(x_ref, we_ref, be_ref, w1_ref, b1_ref, w2_ref, b2_ref,
                out_ref, acc_ref):
    """K-tiled frozen-linear encoder + (Linear -> ReLU -> Linear) classifier.

    grid = (batch_tiles, k_tiles).  acc_ref is the f32 encoder accumulator.
    x arrives f32 and is cast to bf16 in-kernel (avoids a wrapper HBM pass);
    all accumulation is f32 on the MXU.
    """
    k = pl.program_id(1)

    @pl.when(k == 0)
    def _():
        acc_ref[...] = jnp.zeros_like(acc_ref)

    cdt = we_ref.dtype
    acc_ref[...] += jnp.dot(x_ref[...].astype(cdt), we_ref[...],
                            preferred_element_type=jnp.float32)

    @pl.when(k == pl.num_programs(1) - 1)
    def _():
        # Narrow to bf16 right after the bias-add / ReLU to keep vreg pressure
        # low at large batch tiles; keep the epilogue lean (matters on v5e).
        feats = (acc_ref[...] + be_ref[...]).astype(cdt)
        h = jnp.dot(feats, w1_ref[...], preferred_element_type=jnp.float32)
        h = jnp.maximum(h + b1_ref[...], 0.0).astype(cdt)
        out_ref[...] = (jnp.dot(h, w2_ref[...],
                                preferred_element_type=jnp.float32)
                        + b2_ref[...]).astype(out_ref.dtype)


def _fused_linear_kernel(x_ref, w_ref, b_ref, out_ref, acc_ref):
    """relu_layer=False: encoder & classifier pre-fused into one K-tiled matmul."""
    k = pl.program_id(1)

    @pl.when(k == 0)
    def _():
        acc_ref[...] = jnp.zeros_like(acc_ref)

    acc_ref[...] += jnp.dot(x_ref[...].astype(w_ref.dtype), w_ref[...],
                            preferred_element_type=jnp.float32)

    @pl.when(k == pl.num_programs(1) - 1)
    def _():
        out_ref[...] = (acc_ref[...] + b_ref[...]).astype(out_ref.dtype)


# ---------------------------------------------------------------------------
# Parameter preparation (padding / casting / fusion) — done once, outside jit.
# ---------------------------------------------------------------------------

def prepare_params(params, *, relu_layer, compute_dtype=jnp.bfloat16):
    """Pad every lane dim to a multiple of 128, cast weights to compute_dtype.

    Returns (ops, num_classes): ops is the operand tuple passed to the kernel
    after x (weights in compute_dtype, biases in f32).  ops[0] is the large
    (in_dim, out) matrix that gets K-streamed by the kernel grid.
    """
    we, be = params["enc_w"], params["enc_b"]          # (in_dim, D), (1, D)
    in_dim, d = we.shape
    in_p = _round_up(in_dim, LANE)
    d_p = _round_up(d, LANE)

    if relu_layer:
        w1, b1, w2, b2 = params["w1"], params["b1"], params["w2"], params["b2"]
        hdim, c = w1.shape[1], w2.shape[1]
        h_p, c_p = _round_up(hdim, LANE), _round_up(c, LANE)
        ops = (
            _pad2d(we, (in_p, d_p)).astype(compute_dtype),
            _pad2d(be, (1, d_p)).astype(jnp.float32),
            _pad2d(w1, (d_p, h_p)).astype(compute_dtype),
            _pad2d(b1, (1, h_p)).astype(jnp.float32),
            _pad2d(w2, (h_p, c_p)).astype(compute_dtype),
            _pad2d(b2, (1, c_p)).astype(jnp.float32),
        )
        return ops, c

    # relu_layer=False: fuse frozen encoder into the linear classifier.
    # (Saves the small second matmul and a second kernel; after class padding
    # the fused matmul has the same shape as the encoder matmul would.)
    w, b = params["w_lin"], params["b_lin"]            # (D, C), (1, C)
    c = w.shape[1]
    c_p = _round_up(c, LANE)
    w_fused = we.astype(jnp.float32) @ w.astype(jnp.float32)       # (in_dim, C)
    b_fused = be.astype(jnp.float32) @ w.astype(jnp.float32) + b   # (1, C)
    ops = (
        _pad2d(w_fused, (in_p, c_p)).astype(compute_dtype),
        _pad2d(b_fused, (1, c_p)).astype(jnp.float32),
    )
    return ops, c


# ---------------------------------------------------------------------------
# Tiling helpers
# ---------------------------------------------------------------------------

def _pick_tk(in_p, max_tk):
    """Largest multiple of 128 <= max_tk that divides in_p (in_p is 128-mult)."""
    tk = max(LANE, min(max_tk, in_p) // LANE * LANE)
    while in_p % tk != 0:
        tk -= LANE
    return tk


def _vmem_bytes(tb, tk, ops, c_p, acc_cols):
    """Rough per-kernel VMEM working set (double-buffered streamed operands)."""
    x_blk = 2 * tb * tk * 4                                   # f32 x tile
    w0 = ops[0]
    w0_blk = 2 * tk * w0.shape[1] * w0.dtype.itemsize         # streamed weight
    resident = 2 * sum(int(o.size) * o.dtype.itemsize for o in ops[1:])
    out_blk = 2 * tb * c_p * 2                                # bf16 logits tile
    acc = tb * acc_cols * 4                                   # f32 accumulator
    return x_blk + w0_blk + resident + out_blk + acc


def _resident_spec(arr):
    """Whole-array block, constant index_map -> VMEM-resident across the grid.

    Requests single buffering (the block never changes); silently falls back
    if this Pallas build does not expose pipeline_mode / Buffered(1).
    """
    idx = lambda i, k: (0,) * arr.ndim
    try:
        return pl.BlockSpec(arr.shape, idx, pipeline_mode=pl.Buffered(1))
    except Exception:  # pragma: no cover
        return pl.BlockSpec(arr.shape, idx)


# ---------------------------------------------------------------------------
# Forward wrapper
# ---------------------------------------------------------------------------

@functools.partial(
    jax.jit,
    static_argnames=("relu_layer", "num_classes", "compute_dtype",
                     "block_b", "block_k"))
def linear_eval_forward(x_nchw, ops, *, relu_layer, num_classes,
                        compute_dtype=jnp.bfloat16, block_b=256, block_k=1024):
    """Run LinearEval.forward on a prepared (padded/cast/fused) parameter set."""
    B = x_nchw.shape[0]
    x_flat = x_nchw.reshape(B, -1)             # glue: NCHW -> (B, C*H*W), f32
    in_dim = x_flat.shape[1]
    in_p = ops[0].shape[0]                     # padded in_dim (128-multiple)
    c_p = ops[-1].shape[1]                     # padded class width
    acc_cols = ops[0].shape[1]                 # encoder (or fused) output width

    # ---- tile selection ---------------------------------------------------
    b_sub = _round_up(B, SUB)
    tb = min(block_b, b_sub)
    # Keep >=2 batch-grid steps when the batch allows, so the "parallel" axis
    # actually shards across v7x's two TensorCores (neutral on v5e/v6e).
    if b_sub > SUB and b_sub <= tb:
        tb = _round_up((b_sub + 1) // 2, SUB)
    tk = _pick_tk(in_p, block_k)
    # Shrink K (then batch) tiles until the working set fits the VMEM budget.
    while _vmem_bytes(tb, tk, ops, c_p, acc_cols) > VMEM_TILE_BUDGET:
        if tk > LANE:
            tk = _pick_tk(in_p, tk // 2)
        elif tb > SUB:
            tb = max(SUB, tb // 2)
        else:
            break
    b_p = _round_up(B, tb)

    # x stays in its native f32 in HBM (bf16 cast happens in-kernel); only the
    # batch tail — and the trailing columns iff in_dim isn't 128-aligned — are
    # padded here.
    x_pad = jnp.pad(x_flat, ((0, b_p - B), (0, in_p - in_dim)))

    grid = (b_p // tb, in_p // tk)
    x_spec = pl.BlockSpec((tb, tk), lambda i, k: (i, k))
    w0_spec = pl.BlockSpec((tk, acc_cols), lambda i, k: (k, 0))
    out_spec = pl.BlockSpec((tb, c_p), lambda i, k: (i, 0))
    rest_specs = [_resident_spec(op) for op in ops[1:]]

    kernel = _mlp_kernel if relu_layer else _fused_linear_kernel

    out_pad = pl.pallas_call(
        kernel,
        out_shape=jax.ShapeDtypeStruct((b_p, c_p), compute_dtype),  # bf16 logits
        grid=grid,
        in_specs=[x_spec, w0_spec] + rest_specs,
        out_specs=out_spec,
        scratch_shapes=[pltpu.VMEM((tb, acc_cols), jnp.float32)],
        compiler_params=pltpu.CompilerParams(
            dimension_semantics=("parallel", "arbitrary"),
            vmem_limit_bytes=VMEM_LIMIT_BYTES),
    )(x_pad, *ops)

    return out_pad[:B, :num_classes].astype(jnp.float32)


# ---------------------------------------------------------------------------
# Deterministic parameter init (synthetic; matches nn.Linear shapes)
# ---------------------------------------------------------------------------

def init_params(key, in_dim, feature_dim=100, num_classes=10):
    ks = jax.random.split(key, 8)
    scale = 0.02

    def lin(kw, kb, fan_in, fan_out):
        # PyTorch nn.Linear stores W as (out, in); pre-transpose to (in, out).
        w = scale * jax.random.normal(kw, (fan_out, fan_in), jnp.float32)
        b = scale * jax.random.normal(kb, (fan_out,), jnp.float32)
        return w.T, b.reshape(1, fan_out)

    enc_w, enc_b = lin(ks[0], ks[1], in_dim, feature_dim)        # frozen encoder
    w1, b1 = lin(ks[2], ks[3], feature_dim, 2 * feature_dim)     # relu_layer=True
    w2, b2 = lin(ks[4], ks[5], 2 * feature_dim, num_classes)
    w_lin, b_lin = lin(ks[6], ks[7], feature_dim, num_classes)   # relu_layer=False
    return dict(enc_w=enc_w, enc_b=enc_b, w1=w1, b1=b1, w2=w2, b2=b2,
                w_lin=w_lin, b_lin=b_lin)


# ---------------------------------------------------------------------------
# References
# ---------------------------------------------------------------------------

def reference_forward(x_nchw, p, relu_layer=True):
    """Module-semantics f32 reference (unpadded, unfused)."""
    x = x_nchw.reshape(x_nchw.shape[0], -1).astype(jnp.float32)
    feats = x @ p["enc_w"] + p["enc_b"]
    if relu_layer:
        h = jnp.maximum(feats @ p["w1"] + p["b1"], 0.0)
        return h @ p["w2"] + p["b2"]
    return feats @ p["w_lin"] + p["b_lin"]


def matched_reference(x_nchw, ops, relu_layer, num_classes,
                      compute_dtype=jnp.bfloat16):
    """Plain-JAX reference with identical padding/casting/fusion numerics."""
    B = x_nchw.shape[0]
    x = x_nchw.reshape(B, -1).astype(jnp.float32)
    in_p = ops[0].shape[0]
    x = jnp.pad(x, ((0, 0), (0, in_p - x.shape[1]))).astype(compute_dtype)
    if relu_layer:
        we, be, w1, b1, w2, b2 = ops
        feats = (jnp.dot(x, we, preferred_element_type=jnp.float32)
                 + be).astype(compute_dtype)
        h = jnp.maximum(jnp.dot(feats, w1, preferred_element_type=jnp.float32)
                        + b1, 0.0).astype(compute_dtype)
        out = jnp.dot(h, w2, preferred_element_type=jnp.float32) + b2
    else:
        w, b = ops
        out = jnp.dot(x, w, preferred_element_type=jnp.float32) + b
    out = out.astype(compute_dtype).astype(jnp.float32)  # kernel emits bf16 logits
    return out[:, :num_classes]


# ---------------------------------------------------------------------------
# Main
# ---------------------------------------------------------------------------

if __name__ == "__main__":
    key = jax.random.PRNGKey(0)
    kx, kp = jax.random.split(key)

    B, C, H, W = 2, 4, 16, 16           # small NCHW image batch (in_dim = 1024)
    feature_dim, num_classes = 100, 10  # module defaults

    x = jax.random.normal(kx, (B, C, H, W), jnp.float32)
    params = init_params(kp, in_dim=C * H * W,
                         feature_dim=feature_dim, num_classes=num_classes)

    for relu_layer in (True, False):
        ops, nc = prepare_params(params, relu_layer=relu_layer)
        # block_k=512 -> two K-grid steps at in_dim=1024, exercising the
        # accumulator init / epilogue path.
        out = linear_eval_forward(x, ops, relu_layer=relu_layer,
                                  num_classes=nc, block_k=512)
        out = jax.block_until_ready(out)
        assert out.shape == (B, num_classes)

        # Tight check vs a numerics-matched (bf16-cast, padded, fused) reference.
        ref_m = matched_reference(x, ops, relu_layer, nc)
        assert jnp.allclose(out, ref_m, atol=2e-3, rtol=2e-3), \
            f"matched-ref mismatch (relu_layer={relu_layer})"

        # Loose check vs the f32 module-semantics reference (bf16 casts +
        # fusion reassociation introduce bounded quantization error).
        ref_f32 = reference_forward(x, params, relu_layer=relu_layer)
        assert jnp.allclose(out, ref_f32, atol=2e-2, rtol=2e-2), \
            f"f32-ref mismatch (relu_layer={relu_layer})"

    print("KERNEL_OK")
</pallas_src>

<mosaic_0001>
module attributes {stable_mosaic.version = 11 : i64} {
  func.func @_mlp_kernel(%arg0: i32, %arg1: i32, %arg2: memref<8x512xf32, #tpu.memory_space<vmem>>, %arg3: memref<512x128xbf16, #tpu.memory_space<vmem>>, %arg4: memref<1x128xf32, #tpu.memory_space<vmem>>, %arg5: memref<128x256xbf16, #tpu.memory_space<vmem>>, %arg6: memref<1x256xf32, #tpu.memory_space<vmem>>, %arg7: memref<256x128xbf16, #tpu.memory_space<vmem>>, %arg8: memref<1x128xf32, #tpu.memory_space<vmem>>, %arg9: memref<8x128xbf16, #tpu.memory_space<vmem>>, %arg10: memref<8x128xf32, #tpu.memory_space<vmem>>) attributes {dimension_semantics = [#tpu.dimension_semantics<parallel>, #tpu.dimension_semantics<arbitrary>], iteration_bounds = array<i64: 1, 2>, scalar_prefetch = 0 : i64, scratch_operands = 1 : i64, tpu.core_type = #tpu.core_type<tc>, window_params = [{transform_indices = @transform_0, window_bounds = array<i64: 8, 512>}, {transform_indices = @transform_1, window_bounds = array<i64: 512, 128>}, {pipeline_mode = #tpu.pipeline_mode<synchronous>, transform_indices = @transform_2, window_bounds = array<i64: 1, 128>}, {pipeline_mode = #tpu.pipeline_mode<synchronous>, transform_indices = @transform_3, window_bounds = array<i64: 128, 256>}, {pipeline_mode = #tpu.pipeline_mode<synchronous>, transform_indices = @transform_4, window_bounds = array<i64: 1, 256>}, {pipeline_mode = #tpu.pipeline_mode<synchronous>, transform_indices = @transform_5, window_bounds = array<i64: 256, 128>}, {pipeline_mode = #tpu.pipeline_mode<synchronous>, transform_indices = @transform_6, window_bounds = array<i64: 1, 128>}, {transform_indices = @transform_7, window_bounds = array<i64: 8, 128>}]} {
    %c0_i32 = arith.constant 0 : i32
    %0 = arith.cmpi eq, %arg1, %c0_i32 : i32
    %1 = arith.extui %0 : i1 to i32
    %c0_i32_0 = arith.constant 0 : i32
    %2 = arith.cmpi ne, %1, %c0_i32_0 : i32
    scf.if %2 {
      %cst_9 = arith.constant 0.000000e+00 : f32
      %13 = vector.broadcast %cst_9 : f32 to vector<8x128xf32>
      %c0_10 = arith.constant 0 : index
      %c0_11 = arith.constant 0 : index
      %14 = vector.load %arg10[%c0_10, %c0_11] : memref<8x128xf32, #tpu.memory_space<vmem>>, vector<8x128xf32>
      tpu.vector_store %arg10[%c0_10, %c0_11], %13 {strides = array<i32>} : memref<8x128xf32, #tpu.memory_space<vmem>>, vector<8x128xf32>,
    } else {
    }
    %c0 = arith.constant 0 : index
    %c0_1 = arith.constant 0 : index
    %3 = vector.load %arg10[%c0, %c0_1] : memref<8x128xf32, #tpu.memory_space<vmem>>, vector<8x128xf32>
    %c0_2 = arith.constant 0 : index
    %c0_3 = arith.constant 0 : index
    %4 = vector.load %arg2[%c0_2, %c0_3] : memref<8x512xf32, #tpu.memory_space<vmem>>, vector<8x512xf32>
    %5 = arith.truncf %4 : vector<8x512xf32> to vector<8x512xbf16>
    %c0_4 = arith.constant 0 : index
    %c0_5 = arith.constant 0 : index
    %6 = vector.load %arg3[%c0_4, %c0_5] : memref<512x128xbf16, #tpu.memory_space<vmem>>, vector<512x128xbf16>
    %cst = arith.constant dense<0.000000e+00> : vector<8x128xf32>
    %7 = tpu.matmul %5, %6, %cst {dimension_numbers = #tpu.dot_dimension_numbers<[1], [0], [0], [1], [0, 0, 1, 1], [], []>} : vector<8x512xbf16>, vector<512x128xbf16>, vector<8x128xf32> -> vector<8x128xf32>
    %8 = arith.addf %3, %7 : vector<8x128xf32>
    %c0_6 = arith.constant 0 : index
    %c0_7 = arith.constant 0 : index
    %9 = vector.load %arg10[%c0_6, %c0_7] : memref<8x128xf32, #tpu.memory_space<vmem>>, vector<8x128xf32>
    tpu.vector_store %arg10[%c0_6, %c0_7], %8 {strides = array<i32>} : memref<8x128xf32, #tpu.memory_space<vmem>>, vector<8x128xf32>,
    %c1_i32 = arith.constant 1 : i32
    %10 = arith.cmpi eq, %arg1, %c1_i32 : i32
    %11 = arith.extui %10 : i1 to i32
    %c0_i32_8 = arith.constant 0 : i32
    %12 = arith.cmpi ne, %11, %c0_i32_8 : i32
    scf.if %12 {
      %c0_9 = arith.constant 0 : index
      %c0_10 = arith.constant 0 : index
      %13 = vector.load %arg10[%c0_9, %c0_10] : memref<8x128xf32, #tpu.memory_space<vmem>>, vector<8x128xf32>
      %c0_11 = arith.constant 0 : index
      %c0_12 = arith.constant 0 : index
      %14 = vector.load %arg4[%c0_11, %c0_12] : memref<1x128xf32, #tpu.memory_space<vmem>>, vector<1x128xf32>
      %15 = vector.broadcast %14 : vector<1x128xf32> to vector<8x128xf32>
      %16 = arith.addf %13, %15 : vector<8x128xf32>
      %17 = arith.truncf %16 : vector<8x128xf32> to vector<8x128xbf16>
      %c0_13 = arith.constant 0 : index
      %c0_14 = arith.constant 0 : index
      %18 = vector.load %arg5[%c0_13, %c0_14] : memref<128x256xbf16, #tpu.memory_space<vmem>>, vector<128x256xbf16>
      %cst_15 = arith.constant dense<0.000000e+00> : vector<8x256xf32>
      %19 = tpu.matmul %17, %18, %cst_15 {dimension_numbers = #tpu.dot_dimension_numbers<[1], [0], [0], [1], [0, 0, 1, 1], [], []>} : vector<8x128xbf16>, vector<128x256xbf16>, vector<8x256xf32> -> vector<8x256xf32>
      %c0_16 = arith.constant 0 : index
      %c0_17 = arith.constant 0 : index
      %20 = vector.load %arg6[%c0_16, %c0_17] : memref<1x256xf32, #tpu.memory_space<vmem>>, vector<1x256xf32>
      %21 = vector.broadcast %20 : vector<1x256xf32> to vector<8x256xf32>
      %22 = arith.addf %19, %21 : vector<8x256xf32>
      %cst_18 = arith.constant 0.000000e+00 : f32
      %23 = vector.broadcast %cst_18 : f32 to vector<8x256xf32>
      %24 = arith.maximumf %22, %23 : vector<8x256xf32>
      %25 = arith.truncf %24 : vector<8x256xf32> to vector<8x256xbf16>
      %c0_19 = arith.constant 0 : index
      %c0_20 = arith.constant 0 : index
      %26 = vector.load %arg7[%c0_19, %c0_20] : memref<256x128xbf16, #tpu.memory_space<vmem>>, vector<256x128xbf16>
      %cst_21 = arith.constant dense<0.000000e+00> : vector<8x128xf32>
      %27 = tpu.matmul %25, %26, %cst_21 {dimension_numbers = #tpu.dot_dimension_numbers<[1], [0], [0], [1], [0, 0, 1, 1], [], []>} : vector<8x256xbf16>, vector<256x128xbf16>, vector<8x128xf32> -> vector<8x128xf32>
      %c0_22 = arith.constant 0 : index
      %c0_23 = arith.constant 0 : index
      %28 = vector.load %arg8[%c0_22, %c0_23] : memref<1x128xf32, #tpu.memory_space<vmem>>, vector<1x128xf32>
      %29 = vector.broadcast %28 : vector<1x128xf32> to vector<8x128xf32>
      %30 = arith.addf %27, %29 : vector<8x128xf32>
      %31 = arith.truncf %30 : vector<8x128xf32> to vector<8x128xbf16>
      %c0_24 = arith.constant 0 : index
      %c0_25 = arith.constant 0 : index
      %32 = vector.load %arg9[%c0_24, %c0_25] : memref<8x128xbf16, #tpu.memory_space<vmem>>, vector<8x128xbf16>
      tpu.vector_store %arg9[%c0_24, %c0_25], %31 {strides = array<i32>} : memref<8x128xbf16, #tpu.memory_space<vmem>>, vector<8x128xbf16>,
    } else {
    }
    return
  }
  func.func @transform_0(%arg0: i32, %arg1: i32) -> (i32, i32) {
    %c0_i32 = arith.constant 0 : i32
    return %arg0, %arg1 : i32, i32
  }
  func.func @transform_1(%arg0: i32, %arg1: i32) -> (i32, i32) {
    %c0_i32 = arith.constant 0 : i32
    %c0_i32_0 = arith.constant 0 : i32
    return %arg1, %c0_i32 : i32, i32
  }
  func.func @transform_2(%arg0: i32, %arg1: i32) -> (i32, i32) {
    %c0_i32 = arith.constant 0 : i32
    %c0_i32_0 = arith.constant 0 : i32
    %c0_i32_1 = arith.constant 0 : i32
    return %c0_i32, %c0_i32_0 : i32, i32
  }
  func.func @transform_3(%arg0: i32, %arg1: i32) -> (i32, i32) {
    %c0_i32 = arith.constant 0 : i32
    %c0_i32_0 = arith.constant 0 : i32
    %c0_i32_1 = arith.constant 0 : i32
    return %c0_i32, %c0_i32_0 : i32, i32
  }
  func.func @transform_4(%arg0: i32, %arg1: i32) -> (i32, i32) {
    %c0_i32 = arith.constant 0 : i32
    %c0_i32_0 = arith.constant 0 : i32
    %c0_i32_1 = arith.constant 0 : i32
    return %c0_i32, %c0_i32_0 : i32, i32
  }
  func.func @transform_5(%arg0: i32, %arg1: i32) -> (i32, i32) {
    %c0_i32 = arith.constant 0 : i32
    %c0_i32_0 = arith.constant 0 : i32
    %c0_i32_1 = arith.constant 0 : i32
    return %c0_i32, %c0_i32_0 : i32, i32
  }
  func.func @transform_6(%arg0: i32, %arg1: i32) -> (i32, i32) {
    %c0_i32 = arith.constant 0 : i32
    %c0_i32_0 = arith.constant 0 : i32
    %c0_i32_1 = arith.constant 0 : i32
    return %c0_i32, %c0_i32_0 : i32, i32
  }
  func.func @transform_7(%arg0: i32, %arg1: i32) -> (i32, i32) {
    %c0_i32 = arith.constant 0 : i32
    %c0_i32_0 = arith.constant 0 : i32
    return %arg0, %c0_i32 : i32, i32
  }
}

</mosaic_0001>

<bundles_post_ra>
// kernel: linear_eval_forward.1
= control target key start
LH: loop header
LB: loop body
LE: loop exit
PB: predicated region body
PF: predicated region fallthrough
CT: control target
= control target key end

     0   :  { %12 = vsyncpa [#allocation4], 0  ;;  %s1832_s0 = inlined_call_operand.vmem [shape: f32[8,1024], index: 0, kind: input, shape index: {}]   ;;  %s1833_s1 = inlined_call_operand.hbm [shape: bf16[1024,128], index: 1, kind: input, shape index: {}]   ;;  %s1834_s2 = inlined_call_operand.vmem [shape: f32[1,128], index: 2, kind: input, shape index: {}]   ;;  %s1835_s3 = inlined_call_operand.vmem [shape: bf16[128,256], index: 3, kind: input, shape index: {}]   ;;  %s1836_s4 = inlined_call_operand.vmem [shape: f32[1,256], index: 4, kind: input, shape index: {}]   ;;  %s1837_s5 = inlined_call_operand.hbm [shape: bf16[256,128], index: 5, kind: input, shape index: {}]   ;;  %s1838_s6 = inlined_call_operand.vmem [shape: f32[1,128], index: 6, kind: input, shape index: {}]   ;;  %s1839_s7 = inlined_call_operand.vmem [shape: bf16[8,128], index: 7, kind: output, shape index: {}]  }
   0x1   :  { %14 = vsyncpa [#allocation4 + $0x1], 0 }
   0x2   :  { %15 = vsyncpa [#allocation6], 0  ;;  %s1604_s24 = smov 0   ;;  %s1606_s25 = smov 0  }
   0x3   :  { %s1608_s26 = smov 0   ;;  %s1610_s27 = smov 0  }
   0x4   :  { %s1612_s28 = smov 0   ;;  %s1614_s29 = smov 0  }
   0x5 LB: > { %s1156_s30 = sadd.s32 4294967295, %s1556_s29   ;;  %p81_p0 = scmp.ne.s32.totalorder %s1540_s25, %s1536_s24  ;;  %s1556_s29 = sphi %s1614_s29, %s21_s29   ;;  %s1552_s28 = sphi %s1612_s28, %s1853_s28   ;;  %s1548_s27 = sphi %s1610_s27, %s1852_s27   ;;  %s1544_s26 = sphi %s1608_s26, %s1851_s26   ;;  %s1540_s25 = sphi %s1606_s25, %s1850_s25   ;;  %s1536_s24 = sphi %s1604_s24, %s1849_s24  }
   0x6   : > { %p1634_p1 = scmp.eq.s32.totalorder %s1156_s30, 0  ;;  %p1157_p2 = scmp.ge.s32.totalorder %s1556_s29, 1 }
   0x7   : > { %p223_p3 = scmp.lt.s32.totalorder %s1556_s29, 3  ;;  %s1558_s11 = smov [#allocation5]  }
   0x8   : > { %p1642_p4 = por %p1634_p1, %p81_p0  ;;  %s244_s12 = sshll.u32 %s1558_s11, 4  ;;  %s245_s12 = int_to_ptr.vmem [resolvable:$true] %s244_s12 }
   0x9   : > { %p1646_p5 = pnand %p1157_p2, %p223_p3  ;;  %s30_s14 = sadd.s32 1, %s1552_s28 }
   0xa   : > { %s1459_s15 = scalar_lea.vmem %s245_s12, 2048  ;;  %p1467_p12 = scmp.lt.s32.totalorder %s245_s12, %s245_s12 }
   0xb   : > { %p1312_p6 = pneg %p1646_p5  ;;  %p1460_p9 = scmp.ne.s32.totalorder %s245_s12, %s1459_s15 }
   0xc   : > { %p1468_p13 = scmp.lt.s32.totalorder %s1459_s15, %s1459_s15 }
   0xd   : > { %p1654_p7 = pnand %p1312_p6, %p1634_p1 }
   0xe   : > { %p1469_p0 = por %p1468_p13, %p1467_p12 }
   0xf   : > { %p1450_p8 = pneg %p1654_p7 }
  0x11   : > { %p1462_p10 = pnand %p1460_p9, %p1450_p8 }
  0x13   : > { %p1463_p11 = pneg %p1462_p10 }
  0x15   : > { %p1470_p2 = pnand %p1469_p0, %p1463_p11 }
  0x17   : > { %1473 = shalt.err (!%p1470_p2)
}
  0x18   : > { %s1840_s16 = smov 64   ;;  %s1841_s17 = smov 4  }
  0x19   : > { %1315 = dma.hbm_to_vmem [thread:$0]  (!%p1654_p7), %s1837_s5, 2048, %s245_s12, [#allocation6], %s1840_s16, %s1840_s16, %s1841_s17  }
  0x1a   : > { %p31_p3 = scmp.ge.s32.totalorder %s30_s14, 2  ;;  %s68_s20 = sadd.s32 1, %s1544_s26 }
  0x1b   : > { %p75_p6 = scmp.ne.s32.totalorder %s1544_s26, %s1540_s25  ;;  %p76_p8 = scmp.eq.s32.totalorder %s1556_s29, 0 }
  0x1c   : > { %s1855_s14 = smov (%p31_p3, %s30_s14), 0  ;;  %p1321_p10 = scmp.lt.s32.totalorder %s1556_s29, 2 }
  0x1d   : > { %p77_p9 = por %p76_p8, %p75_p6  ;;  %s65_s21 = ssub.s32 %s1552_s28, %s1855_s14 }
  0x1e   : > { %s274_s22 = sand.u32 1, %s1544_s26   ;;  %p66_p11 = scmp.eq.s32.totalorder %s65_s21, 0 }
  0x1f   : > { %s1160_s23 = sshll.u32 %s274_s22, 8  ;;  %s1239_s24 = sshll.u32 %s1552_s28, 12 }
  0x20   : > { %s1681_s30 = scalar_select %p66_p11, %s1544_s26, %s68_s20  }
  0x21   : > { %s284_s12 = scalar_lea.hbm %s1833_s1, %s1239_s24  ;;  %s278_s15 = scalar_lea.vmem [#allocation3], %s1160_s23 }
  0x22   : > { %s285_s18 = sshll.u32 %s278_s15, 4  ;;  %p1686_p7 = pnand %p1321_p10, %p77_p9  ;;  %s286_s18 = int_to_ptr.vmem [resolvable:$true] %s285_s18 }
  0x23   : > { %s275_s16 = scalar_lea.sflag [#allocation4], %s274_s22  ;;  %s1487_s21 = scalar_lea.vmem %s286_s18, 4096 }
  0x24   : > { %p1476_p12 = pneg %p1686_p7  ;;  %p1488_p13 = scmp.ne.s32.totalorder %s286_s18, %s1487_s21 }
  0x25   : > { %s1561_s20 = smov [#allocation3]  }
  0x26   : > { %p1490_p0 = pnand %p1488_p13, %p1476_p12  ;;  %s1492_s17 = sshll.u32 %s1561_s20, 4  ;;  %s1493_s17 = int_to_ptr.vmem [resolvable:$false] %s1492_s17 }
  0x27   : > { %s1494_s11 = scalar_lea.vmem %s1493_s17, 8192  ;;  %p1495_p3 = scmp.lt.s32.totalorder %s286_s18, %s1493_s17 }
  0x28   : > { %p1491_p2 = pneg %p1490_p0  ;;  %p1496_p6 = scmp.lt.s32.totalorder %s1494_s11, %s1487_s21 }
  0x2a   : > { %p1497_p8 = por %p1496_p6, %p1495_p3 }
  0x2c   : > { %p1498_p9 = pnand %p1497_p8, %p1491_p2 }
  0x2e   : > { %1501 = shalt.err (!%p1498_p9)
}
  0x2f   : > { %s1847_s23 = smov 4   ;;  %s1848_s24 = smov 64  }
  0x30   : > { %1319 = dma.hbm_to_vmem [thread:$0]  (!%p1686_p7), %s284_s12, 4096, %s286_s18, %s275_s16, %s1848_s24, %s1848_s24, %s1847_s23  }
  0x31   : > { %297 = sbr.rel (%p1646_p5) target bundleno = 740 (0x2e4), region = 48  ;;  %s299_s22 = sand.u32 (!%p1646_p5), 1, %s1540_s25  }
  0x32   : > { %s1164_s13 = sshll.u32 (!%p1646_p5), %s299_s22, 8  ;;  %s300_s15 = scalar_lea.sflag (!%p1646_p5), [#allocation4], %s299_s22 }
  0x33   : > { %s1700_s20 = scalar_lea.vmem (!%p1646_p5), [#allocation3], %s1164_s13 }
  0x36   : > { %1527 = dma.done.wait (%p1642_p4), %s300_s15, 4096  }
  0x37   : > { %1529 = vsyncadd (%p1642_p4), %s300_s15, 4294963200 }
  0x38   : > { %1531 = dma.done.wait (%p1634_p1), [#allocation6], 2048  }
  0x39   : > { %1533 = vsyncadd (%p1634_p1), [#allocation6], 4294965248  ;;  %s1166_s10 = sshll.u32 %s1548_s27, 2  ;;  %p1168_p10 = scmp.ne.s32.totalorder %s1548_s27, 0 }
  0x3a   : > { %p349_p5 = scmp.lt.s32.totalorder %s1166_s10, 7 }
  0x3b   : > { %365 = sbr.rel (%p1168_p10) target bundleno = 66 (0x42), region = 60 }
  0x3c   : > { %s1857_s10 = smov (!%p349_p5, %s1166_s10), 7 }
  0x3d   : > { %s1167_s16 = sshll.u32 %s1857_s10, 3 }
  0x3e   : > { %s1714_s18 = scalar_lea.vmem %s1832_s0, %s1167_s16 }
  0x40   : > { %v1562_v0 = vmov 0.0  }
  0x41   : > { %366 = vst [vmem:[#allocation2] sm:$0xff] %v1562_v0 }
  0x42 PF: > { %v1376_v1 = vld [vmem:[%s1700_s20 + $0x78] sm:$0xff]   ;;  %v1380_v5 = vld [vmem:[%s1700_s20 + $0x70] sm:$0xff]   ;;  %v1384_v9 = vld [vmem:[%s1700_s20 + $0x68] sm:$0xff]   ;;  %p1201_p1 = scmp.ne.s32.totalorder %s1548_s27, 1 }
  0x43   : > { %v1377_v2 = vld [vmem:[%s1700_s20 + $0xf8] sm:$0xff]   ;;  %1240 = vmatprep.subr.bf16.mxu0 %v1376_v1  ;;  %v1381_v6 = vld [vmem:[%s1700_s20 + $0xf0] sm:$0xff]   ;;  %v1385_v10 = vld [vmem:[%s1700_s20 + $0xe8] sm:$0xff]  }
  0x44   : > { %v1378_v3 = vld [vmem:[%s1700_s20 + $0x38] sm:$0xff]   ;;  %1262 = vmatprep.subr.bf16.mxu1 %v1377_v2  ;;  %v1382_v7 = vld [vmem:[%s1700_s20 + $0x30] sm:$0xff]   ;;  %v1386_v11 = vld [vmem:[%s1700_s20 + $0x28] sm:$0xff]  }
  0x45   : > { %v1379_v4 = vld [vmem:[%s1700_s20 + $0xb8] sm:$0xff]   ;;  %1241 = vmatpush3.bf16.msra.mxu0 %v1378_v3  ;;  %v1383_v8 = vld [vmem:[%s1700_s20 + $0xb0] sm:$0xff]   ;;  %v1387_v12 = vld [vmem:[%s1700_s20 + $0xa8] sm:$0xff]  }
  0x46   : > { %1263 = vmatpush3.bf16.msra.mxu1 %v1379_v4  ;;  %1242 = vmatprep.subr.bf16.mxu0 %v1380_v5  ;;  %v1388_v13 = vld [vmem:[%s1700_s20 + $0x60] sm:$0xff]   ;;  %v1392_v17 = vld [vmem:[%s1700_s20 + $0x58] sm:$0xff]   ;;  %v1396_v21 = vld [vmem:[%s1700_s20 + $0x50] sm:$0xff]  }
  0x47   : > { %1264 = vmatprep.subr.bf16.mxu1 %v1381_v6  ;;  %v1389_v14 = vld [vmem:[%s1700_s20 + $0xe0] sm:$0xff]   ;;  %v1393_v18 = vld [vmem:[%s1700_s20 + $0xd8] sm:$0xff]   ;;  %v1397_v22 = vld [vmem:[%s1700_s20 + $0xd0] sm:$0xff]  }
  0x48   : > { %v1390_v15 = vld [vmem:[%s1700_s20 + $0x20] sm:$0xff]   ;;  %v1394_v19 = vld [vmem:[%s1700_s20 + $0x18] sm:$0xff]   ;;  %v1398_v23 = vld [vmem:[%s1700_s20 + $0x10] sm:$0xff]  }
  0x49   : > { %1243 = vmatpush3.bf16.msra.mxu0 %v1382_v7  ;;  %v1391_v16 = vld [vmem:[%s1700_s20 + $0xa0] sm:$0xff]   ;;  %v1395_v20 = vld [vmem:[%s1700_s20 + $0x98] sm:$0xff]   ;;  %v1399_v24 = vld [vmem:[%s1700_s20 + $0x90] sm:$0xff]  }
  0x4a   : > { %1265 = vmatpush3.bf16.msra.mxu1 %v1383_v8  ;;  %1244 = vmatprep.subr.bf16.mxu0 %v1384_v9  ;;  %v1400_v25 = vld [vmem:[%s1700_s20 + $0x48] sm:$0xff]   ;;  %v1404_v29 = vld [vmem:[%s1700_s20 + $0x40] sm:$0xff]   ;;  %v371_v34 = vld [vmem:[%s1714_s18 + $0x18] sm:$0xff] }
  0x4b   : > { %1266 = vmatprep.subr.bf16.mxu1 %v1385_v10  ;;  %v1401_v26 = vld [vmem:[%s1700_s20 + $0xc8] sm:$0xff]   ;;  %v1405_v30 = vld [vmem:[%s1700_s20 + $0xc0] sm:$0xff]   ;;  %v368_v35 = vld [vmem:[%s1714_s18] sm:$0xff]  ;;  %v375_v37 = vpack.c.bf16 %v371_v34, %v371_v34 }
  0x4c   : > { %v1402_v27 = vld [vmem:[%s1700_s20 + $0x8] sm:$0xff]   ;;  %v1406_v31 = vld [vmem:[%s1700_s20] sm:$0xff]   ;;  %v372_v38 = vpack.c.bf16 %v368_v35, %v368_v35  ;;  %v367_v47 = vld [vmem:[#allocation2] sm:$0xff] }
  0x4d   : > { %1245 = vmatpush3.bf16.msra.mxu0 %v1386_v11  ;;  %v1403_v28 = vld [vmem:[%s1700_s20 + $0x88] sm:$0xff]   ;;  %v1407_v32 = vld [vmem:[%s1700_s20 + $0x80] sm:$0xff]   ;;  %704 = vmatprep.mubr.bf16.mxu1 %v375_v37 }
  0x4e   : > { %1267 = vmatpush3.bf16.msra.mxu1 %v1387_v12  ;;  %1246 = vmatprep.subr.bf16.mxu0 %v1388_v13  ;;  %v369_v33 = vld [vmem:[%s1714_s18 + $0x8] sm:$0xff]  ;;  %v370_v39 = vld [vmem:[%s1714_s18 + $0x10] sm:$0xff] }
  0x4f   : > { %1268 = vmatprep.subr.bf16.mxu1 %v1389_v14  ;;  %v373_v36 = vpack.c.bf16 %v369_v33, %v369_v33  ;;  %v374_v40 = vpack.c.bf16 %v370_v39, %v370_v39 }
  0x51   : > { %1247 = vmatpush3.bf16.msra.mxu0 %v1390_v15  ;;  %664 = vmatprep.mubr.bf16.mxu0 %v373_v36 }
  0x52   : > { %1269 = vmatpush3.bf16.msra.mxu1 %v1391_v16  ;;  %1248 = vmatprep.subr.bf16.mxu0 %v1392_v17 }
  0x53   : > { %1270 = vmatprep.subr.bf16.mxu1 %v1393_v18 }
  0x55   : > { %1249 = vmatpush3.bf16.msra.mxu0 %v1394_v19 }
  0x56   : > { %1271 = vmatpush3.bf16.msra.mxu1 %v1395_v20  ;;  %1250 = vmatprep.subr.bf16.mxu0 %v1396_v21 }
  0x57   : > { %1272 = vmatprep.subr.bf16.mxu1 %v1397_v22 }
  0x59   : > { %1251 = vmatpush3.bf16.msra.mxu0 %v1398_v23 }
  0x5a   : > { %1273 = vmatpush3.bf16.msra.mxu1 %v1399_v24  ;;  %1252 = vmatprep.subr.bf16.mxu0 %v1400_v25 }
  0x5b   : > { %1274 = vmatprep.subr.bf16.mxu1 %v1401_v26 }
  0x5d   : > { %1253 = vmatpush3.bf16.msra.mxu0 %v1402_v27 }
  0x5e   : > { %1275 = vmatpush3.bf16.msra.mxu1 %v1403_v28  ;;  %1254 = vmatprep.subr.bf16.mxu0 %v1404_v29 }
  0x5f   : > { %1276 = vmatprep.subr.bf16.mxu1 %v1405_v30 }
  0x61   : > { %1255 = vmatpush3.bf16.msra.mxu0 %v1406_v31 }
  0x62   : > { %1277 = vmatpush3.bf16.msra.mxu1 %v1407_v32 }
  0x64   : > { %665 = vmatmul.mubr.bf16.vlgmr.msra.gmra.mxu0 %v372_v38 }
  0x65   : > { %705 = vmatmul.mubr.bf16.vlgmr.msra.gmra.mxu1 %v374_v40 }
 0x124   : > { %v1256_v41 = vpop.f32.mrf.mxu0 }
 0x125   : > { %v1278_v42 = vpop.f32.mrf.mxu1 }
 0x126   : > { %v1257_v43 = vpop.f32.mrf.mxu0 }
 0x127   : > { %v1279_v44 = vpop.f32.mrf.mxu1  ;;  %v1258_v45 = vadd.f32 %v1257_v43, %v1256_v41 }
 0x128   : > { %v1280_v46 = vadd.f32 %v1279_v44, %v1278_v42  ;;  %v1259_v48 = vpop.f32.mrf.mxu0 }
 0x129   : > { %v1281_v49 = vpop.f32.mrf.mxu1 }
 0x12a   : > { %v707_v50 = vadd.f32 %v1280_v46, %v1258_v45  ;;  %v1260_v51 = vpop.f32.mrf.mxu0  ;;  %717 = sbr.rel (%p1201_p1) target bundleno = 740 (0x2e4), region = 64 }
 0x12b   : > { %v1282_v52 = vpop.f32.mrf.mxu1 }
 0x12c   : > { %v712_v53 = vadd.f32 %v707_v50, %v367_v47 }
 0x12e   : > { %713 = vst [vmem:[#allocation2] sm:$0xff] %v712_v53 }
 0x12f   : > { %v1408_v54 = vld [vmem:[%s1835_s3 + $0x74] ss:$8 sps:$4 sm:$0xff]   ;;  %v1410_v55 = vld [vmem:[%s1835_s3 + $0x70] ss:$8 sps:$4 sm:$0xff]   ;;  %v1563_v56 = vmov 0   ;;  %v1432_v0 = vld [vmem:[#allocation5 + $0x78] sm:$0xff]   ;;  %v746_v27 = vlaneseq }
 0x130   : > { %868 = vmatprep.mubr.bf16.mxu0 %v1563_v56  ;;  %836 = vmatprep.subr.bf16.mxu0 %v1408_v54  ;;  %v1411_v57 = vld [vmem:[%s1835_s3 + $0x64] ss:$8 sps:$4 sm:$0xff]   ;;  %v1413_v58 = vld [vmem:[%s1835_s3 + $0x60] ss:$8 sps:$4 sm:$0xff]   ;;  %v1414_v59 = vld [vmem:[%s1835_s3 + $0x54] ss:$8 sps:$4 sm:$0xff]  }
 0x131   : > { %837 = vmatpush1.bf16.msra.mxu0 %v1410_v55  ;;  %v1416_v60 = vld [vmem:[%s1835_s3 + $0x50] ss:$8 sps:$4 sm:$0xff]   ;;  %v1417_v61 = vld [vmem:[%s1835_s3 + $0x44] ss:$8 sps:$4 sm:$0xff]   ;;  %v1419_v62 = vld [vmem:[%s1835_s3 + $0x40] ss:$8 sps:$4 sm:$0xff]   ;;  %1284 = vmatprep.subr.bf16.mxu1 %v1432_v0 }
 0x132   : > { %838 = vmatprep.subr.bf16.mxu0 %v1411_v57  ;;  %v1420_v63 = vld [vmem:[%s1835_s3 + $0x34] ss:$8 sps:$4 sm:$0xff]   ;;  %v1422_v1 = vld [vmem:[%s1835_s3 + $0x30] ss:$8 sps:$4 sm:$0xff]   ;;  %v1433_v2 = vld [vmem:[#allocation5 + $0x38] sm:$0xff]   ;;  %v747_v28 = vshrl.u32 %v746_v27, 7 }
 0x133   : > { %v1423_v3 = vld [vmem:[%s1835_s3 + $0x24] ss:$8 sps:$4 sm:$0xff]   ;;  %v1434_v4 = vld [vmem:[#allocation5 + $0x70] sm:$0xff]   ;;  %1285 = vmatpush3.bf16.msra.mxu1 %v1433_v2  ;;  %v1436_v6 = vld [vmem:[#allocation5 + $0x68] sm:$0xff]  }
 0x134   : > { %v1435_v5 = vld [vmem:[#allocation5 + $0x30] sm:$0xff]   ;;  %1286 = vmatprep.subr.bf16.mxu1 %v1434_v4  ;;  %v1425_v7 = vld [vmem:[%s1835_s3 + $0x20] ss:$8 sps:$4 sm:$0xff]   ;;  %v1437_v9 = vld [vmem:[#allocation5 + $0x28] sm:$0xff]   ;;  %v748_v29 = vsub.s32 0, %v747_v28  ;;  %v752_v31 = vsub.s32 1, %v747_v28 }
 0x135   : > { %839 = vmatpush1.bf16.msra.mxu0 %v1413_v58  ;;  %v1426_v8 = vld [vmem:[%s1835_s3 + $0x14] ss:$8 sps:$4 sm:$0xff]   ;;  %v1438_v10 = vld [vmem:[#allocation5 + $0x60] sm:$0xff]   ;;  %v1428_v11 = vld [vmem:[%s1835_s3 + $0x10] ss:$8 sps:$4 sm:$0xff]  }
 0x136   : > { %840 = vmatprep.subr.bf16.mxu0 %v1414_v59  ;;  %v718_v12 = vld [vmem:[#allocation2] sm:$0xff]  ;;  %v1439_v15 = vld [vmem:[#allocation5 + $0x20] sm:$0xff]   ;;  %v1442_v20 = vld [vmem:[#allocation5 + $0x50] sm:$0xff]  }
 0x137   : > { %1287 = vmatpush3.bf16.msra.mxu1 %v1435_v5  ;;  %v1429_v13 = vld [vmem:[%s1835_s3 + $0x4] ss:$8 sps:$4 sm:$0xff]   ;;  %v1202_v14 = vld [vmem:[%s1834_s2] ss:$0 sm:$0xff]  ;;  %v1443_v22 = vld [vmem:[#allocation5 + $0x10] sm:$0xff]  }
 0x138   : > { %1288 = vmatprep.subr.bf16.mxu1 %v1436_v6  ;;  %v1440_v16 = vld [vmem:[#allocation5 + $0x58] sm:$0xff]   ;;  %v726_v17 = vadd.f32 %v1202_v14, %v718_v12  ;;  %v1444_v23 = vld [vmem:[#allocation5 + $0x48] sm:$0xff]   ;;  %v1446_v25 = vld [vmem:[#allocation5 + $0x40] sm:$0xff]  }
 0x139   : > { %841 = vmatpush1.bf16.msra.mxu0 %v1416_v60  ;;  %v1431_v18 = vld [vmem:[%s1835_s3] ss:$8 sps:$4 sm:$0xff]   ;;  %v1445_v24 = vld [vmem:[#allocation5 + $0x8] sm:$0xff]  }
 0x13a   : > { %842 = vmatprep.subr.bf16.mxu0 %v1417_v61  ;;  %v1441_v19 = vld [vmem:[#allocation5 + $0x18] sm:$0xff]   ;;  %v727_v21 = vpack.c.bf16 %v726_v17, %v726_v17  ;;  %v1447_v26 = vld [vmem:[#allocation5] sm:$0xff]  }
 0x13b   : > { %1289 = vmatpush3.bf16.msra.mxu1 %v1437_v9  ;;  %v744_v30 = vld [vmem:[%s1836_s4] sm:$0x3] }
 0x13c   : > { %1290 = vmatprep.subr.bf16.mxu1 %v1438_v10  ;;  %v749_v32 = vrot.slane %v744_v30, %v748_v29  ;;  %v753_v33 = vrot.slane %v744_v30, %v752_v31  ;;  %v1219_v45 = vld [vmem:[%s1838_s6] ss:$0 sm:$0xff] }
 0x13d   : > { %843 = vmatpush1.bf16.msra.mxu0 %v1419_v62 }
 0x13e   : > { %844 = vmatprep.subr.bf16.mxu0 %v1420_v63 }
 0x13f   : > { %1291 = vmatpush3.bf16.msra.mxu1 %v1439_v15 }
 0x140   : > { %1292 = vmatprep.subr.bf16.mxu1 %v1440_v16 }
 0x141   : > { %845 = vmatpush1.bf16.msra.mxu0 %v1422_v1 }
 0x142   : > { %846 = vmatprep.subr.bf16.mxu0 %v1423_v3 }
 0x143   : > { %1293 = vmatpush3.bf16.msra.mxu1 %v1441_v19 }
 0x144   : > { %1294 = vmatprep.subr.bf16.mxu1 %v1442_v20 }
 0x145   : > { %847 = vmatpush1.bf16.msra.mxu0 %v1425_v7 }
 0x146   : > { %848 = vmatprep.subr.bf16.mxu0 %v1426_v8 }
 0x147   : > { %1295 = vmatpush3.bf16.msra.mxu1 %v1443_v22 }
 0x148   : > { %1296 = vmatprep.subr.bf16.mxu1 %v1444_v23 }
 0x149   : > { %849 = vmatpush1.bf16.msra.mxu0 %v1428_v11 }
 0x14a   : > { %850 = vmatprep.subr.bf16.mxu0 %v1429_v13 }
 0x14b   : > { %1297 = vmatpush3.bf16.msra.mxu1 %v1445_v24 }
 0x14c   : > { %1298 = vmatprep.subr.bf16.mxu1 %v1446_v25 }
 0x14d   : > { %851 = vmatpush1.bf16.msra.mxu0 %v1431_v18 }
 0x14f   : > { %1299 = vmatpush3.bf16.msra.mxu1 %v1447_v26 }
 0x150   : > { %869 = vmatmul.mubr.bf16.vlgmr.msra.gmra.mxu0 %v727_v21 }
 0x210   : > { %v870_v34 = vpop.f32.mrf.mxu0 }
 0x211   : > { %v871_v35 = vadd.f32 %v870_v34, %v749_v32 }
 0x212   : > { %v872_v36 = vpop.f32.mrf.mxu0 }
 0x213   : > { %v873_v37 = vadd.f32 %v872_v36, %v753_v33  ;;  %v877_v38 = vmax.f32 %v871_v35, 0.0 }
 0x214   : > { %v874_v39 = vpop.f32.mrf.mxu0 }
 0x215   : > { %v878_v40 = vmax.f32 %v873_v37, 0.0  ;;  %v879_v43 = vpack.c.bf16 %v877_v38, %v877_v38 }
 0x216   : > { %v875_v41 = vpop.f32.mrf.mxu0 }
 0x217   : > { %v880_v42 = vpack.c.bf16 %v878_v40, %v878_v40 }
 0x219   : > { %1048 = vmatprep.mubr.bf16.mxu1 %v880_v42 }
 0x21a   : > { %1049 = vmatmul.mubr.bf16.vlgmr.msra.gmra.mxu1 %v879_v43 }
 0x2da   : > { %v1300_v44 = vpop.f32.mrf.mxu1 }
 0x2dc   : > { %v1301_v46 = vpop.f32.mrf.mxu1 }
 0x2dd   : > { %v1302_v47 = vadd.f32 %v1301_v46, %v1300_v44 }
 0x2de   : > { %v1303_v48 = vpop.f32.mrf.mxu1 }
 0x2df   : > { %v1051_v49 = vadd.f32 %v1302_v47, %v1219_v45 }
 0x2e0   : > { %v1304_v50 = vpop.f32.mrf.mxu1 }
 0x2e1   : > { %v1056_v51 = vpack.c.bf16 %v1051_v49, %v1051_v49 }
 0x2e3   : > { %1057 = vst [vmem:[%s1839_s7] sm:$0xf] %v1056_v51 }
 0x2e4 PF: > { %s21_s29 = sadd.s32 1, %s1556_s29   ;;  %s1849_s24 = smov %s1540_s25 }
 0x2e5   : > { %p18_p4 = scmp.ge.s32.totalorder %s21_s29, 4   ;;  %s1850_s25 = smov %s1544_s26 }
 0x2e6   : > { %s1851_s26 = smov %s1681_s30  ;;  %s1852_s27 = smov %s1552_s28 }
 0x2e7   : > { %s1853_s28 = smov %s1855_s14  ;;  %20 = sbr.rel (!%p18_p4) target bundleno = 5 (0x5), region = 103 }
 0x2ec   :  { %1077 = vsyncpa [#allocation4], 1 }
 0x2ed   :  { %1079 = vsyncpa [#allocation4 + $0x1], 1 }
 0x2ee   :  { %1080 = vsyncpa [#allocation6], 1 }

</bundles_post_ra>
